<compile_context>
chip_gen: v7x
topology: tpu7x:2x2x1
jax: 0.10.0
libtpu: 0.0.40
codegen_flags: <defaults>
</compile_context>

<pallas_src>
import functools
import numpy as np
import jax
import jax.numpy as jnp
from jax.experimental import pallas as pl
from jax.experimental.pallas import tpu as pltpu

_LANE = 128


def _cdiv(a, b):
    return -(-a // b)


def _vmem_budget_bytes():
    """Scoped-VMEM budget: <=48 MiB and <=75% of physical (v7x: 64 MiB/TC)."""
    phys = 64 * 1024 * 1024
    try:
        phys = int(pltpu.get_tpu_info().vmem_capacity_bytes)
    except Exception:
        pass
    return int(min(48 * 1024 * 1024, (phys * 3) // 4))


def _dice_partial_kernel(pred_ref, target_ref, inter_out, sums_out,
                         inter_acc, sums_acc, *, n_row, tile_n, need_mask):
    """Grid = (K,): K tiles the flattened per-row reduction axis.

    inter_acc / sums_acc are (rows, 1) f32 VMEM accumulators that persist
    across K and are flushed to the outputs only on the last step.
    """
    k = pl.program_id(0)

    @pl.when(k == 0)
    def _init():
        inter_acc[...] = jnp.zeros_like(inter_acc)
        sums_acc[...] = jnp.zeros_like(sums_acc)

    p = pred_ref[...].astype(jnp.float32)
    t = target_ref[...].astype(jnp.float32)

    if need_mask:
        # Ragged tail: lanes past n_row in the last block hold unspecified data.
        # Zeroing them is exact for this loss (no sigmoid, pads add 0 to sums).
        col = jax.lax.broadcasted_iota(jnp.int32, p.shape, dimension=1)
        valid = (k * tile_n + col) < n_row
        p = jnp.where(valid, p, 0.0)
        t = jnp.where(valid, t, 0.0)

    # Two cross-lane reductions per step:
    #   intersection part = sum(p*t); denominator part = sum(p) + sum(t) = sum(p+t)
    inter_acc[...] += jnp.sum(p * t, axis=1, keepdims=True)
    sums_acc[...] += jnp.sum(p + t, axis=1, keepdims=True)

    @pl.when(k == pl.num_programs(0) - 1)
    def _finalize():
        inter_out[...] = inter_acc[...]
        sums_out[...] = sums_acc[...]


def dice_loss(pred, target):
    """Pallas equivalent of DiceLoss()(pred, target). Returns a scalar."""
    assert pred.shape == target.shape
    B = int(pred.shape[0])
    N = int(np.prod(pred.shape[1:])) if pred.ndim > 1 else 1

    isz_p = jnp.dtype(pred.dtype).itemsize
    isz_t = jnp.dtype(target.dtype).itemsize

    # Dtype-aware sublane fill: a packed vreg holds 8 f32 / 16 bf16 / 32 int8
    # sublanes. Split each sample into R rows so rows = B*R fills them.
    sub = max(8, 32 // max(1, min(isz_p, isz_t)))
    r_needed = sub // int(np.gcd(B, sub))
    R = int(np.gcd(N, r_needed))        # largest power-of-2 divisor of N <= r_needed
    rows = B * R
    n_row = N // R

    pred2 = pred.reshape(rows, n_row)
    target2 = target.reshape(rows, n_row)

    # Byte-targeted reduction tile: multi-MiB per grid step amortizes the
    # fixed per-step overhead; stay within the scoped-VMEM budget accounting
    # for 2x pipeline double-buffering of both inputs.
    vmem_budget = _vmem_budget_bytes()
    bytes_per_col = rows * (isz_p + isz_t)
    target_step_bytes = 8 * 1024 * 1024                       # both inputs together
    max_step_bytes = max(_LANE * bytes_per_col, (vmem_budget - (4 << 20)) // 2)
    step_bytes = min(target_step_bytes, max_step_bytes)
    tile_n = max(_LANE, (step_bytes // bytes_per_col) // _LANE * _LANE)

    if tile_n >= n_row:
        tile_n = n_row          # full-extent last dim: always a legal block shape
        K = 1
        need_mask = False
    else:
        K = _cdiv(n_row, tile_n)
        need_mask = (n_row % tile_n) != 0   # mask tail in-kernel; no jnp.pad copies

    step_bytes_actual = rows * tile_n * (isz_p + isz_t)
    vmem_limit = int(min(vmem_budget,
                         max(16 * 1024 * 1024,
                             2 * step_bytes_actual + (4 << 20))))

    in_spec = pl.BlockSpec((rows, tile_n), lambda k: (0, k))
    out_spec = pl.BlockSpec((rows, 1), lambda k: (0, 0))

    kernel = functools.partial(_dice_partial_kernel, n_row=n_row,
                               tile_n=tile_n, need_mask=need_mask)

    inter, sums = pl.pallas_call(
        kernel,
        out_shape=(jax.ShapeDtypeStruct((rows, 1), jnp.float32),
                   jax.ShapeDtypeStruct((rows, 1), jnp.float32)),
        grid_spec=pltpu.PrefetchScalarGridSpec(
            num_scalar_prefetch=0,
            grid=(K,),
            in_specs=[in_spec, in_spec],
            out_specs=[out_spec, out_spec],
            scratch_shapes=[pltpu.VMEM((rows, 1), jnp.float32),
                            pltpu.VMEM((rows, 1), jnp.float32)]),
        compiler_params=pltpu.CompilerParams(
            dimension_semantics=("arbitrary",),
            vmem_limit_bytes=vmem_limit),
    )(pred2, target2)

    # Tiny per-sample combine (O(B*R) scalars) in plain JAX.
    inter_b = inter.reshape(B, R).sum(axis=1)   # (B,)
    sums_b = sums.reshape(B, R).sum(axis=1)     # (B,)
    smooth = jnp.float32(1.0)
    dice_score = (2.0 * inter_b + smooth) / (sums_b + smooth)
    return 1.0 - jnp.sum(dice_score) / B


def _dice_loss_ref(pred, target):
    # Pure-JAX reference mirroring the PyTorch module exactly.
    B = pred.shape[0]
    p = pred.reshape(B, -1).astype(jnp.float32)
    t = target.reshape(B, -1).astype(jnp.float32)
    smooth = 1.0
    inter = jnp.sum(p * t, axis=1)
    score = (2.0 * inter + smooth) / (jnp.sum(p, axis=1) + jnp.sum(t, axis=1) + smooth)
    return 1.0 - jnp.sum(score) / B


if __name__ == "__main__":
    key = jax.random.PRNGKey(0)
    k1, k2 = jax.random.split(key)

    B, C, H, W = 2, 4, 16, 16
    pred = jax.random.normal(k1, (B, C, H, W), dtype=jnp.float32)
    # Binary segmentation-style target.
    target = (jax.random.uniform(k2, (B, C, H, W)) > 0.5).astype(jnp.float32)

    out = jax.block_until_ready(dice_loss(pred, target))
    ref = jax.block_until_ready(_dice_loss_ref(pred, target))
    np.testing.assert_allclose(np.asarray(out), np.asarray(ref),
                               rtol=1e-5, atol=1e-5)

    print("KERNEL_OK")
</pallas_src>

<mosaic_0001>
module attributes {stable_mosaic.version = 11 : i64} {
  func.func @_dice_partial_kernel(%arg0: i32, %arg1: memref<8x256xf32, #tpu.memory_space<vmem>>, %arg2: memref<8x256xf32, #tpu.memory_space<vmem>>, %arg3: memref<8x1xf32, #tpu.memory_space<vmem>>, %arg4: memref<8x1xf32, #tpu.memory_space<vmem>>, %arg5: memref<8x1xf32, #tpu.memory_space<vmem>>, %arg6: memref<8x1xf32, #tpu.memory_space<vmem>>) attributes {dimension_semantics = [#tpu.dimension_semantics<arbitrary>], iteration_bounds = array<i64: 1>, scalar_prefetch = 0 : i64, scratch_operands = 2 : i64, tpu.core_type = #tpu.core_type<tc>, window_params = [{transform_indices = @transform_0, window_bounds = array<i64: 8, 256>}, {transform_indices = @transform_1, window_bounds = array<i64: 8, 256>}, {pipeline_mode = #tpu.pipeline_mode<synchronous>, transform_indices = @transform_2, window_bounds = array<i64: 8, 1>}, {pipeline_mode = #tpu.pipeline_mode<synchronous>, transform_indices = @transform_3, window_bounds = array<i64: 8, 1>}]} {
    %c0_i32 = arith.constant 0 : i32
    %0 = arith.cmpi eq, %arg0, %c0_i32 : i32
    %1 = arith.extui %0 : i1 to i32
    %c0_i32_0 = arith.constant 0 : i32
    %2 = arith.cmpi ne, %1, %c0_i32_0 : i32
    scf.if %2 {
      %cst_15 = arith.constant 0.000000e+00 : f32
      %20 = vector.broadcast %cst_15 : f32 to vector<8x1xf32>
      %c0_16 = arith.constant 0 : index
      %c0_17 = arith.constant 0 : index
      %21 = vector.load %arg5[%c0_16, %c0_17] : memref<8x1xf32, #tpu.memory_space<vmem>>, vector<8x1xf32>
      tpu.vector_store %arg5[%c0_16, %c0_17], %20 {strides = array<i32>} : memref<8x1xf32, #tpu.memory_space<vmem>>, vector<8x1xf32>,
      %cst_18 = arith.constant 0.000000e+00 : f32
      %22 = vector.broadcast %cst_18 : f32 to vector<8x1xf32>
      %c0_19 = arith.constant 0 : index
      %c0_20 = arith.constant 0 : index
      %23 = vector.load %arg6[%c0_19, %c0_20] : memref<8x1xf32, #tpu.memory_space<vmem>>, vector<8x1xf32>
      tpu.vector_store %arg6[%c0_19, %c0_20], %22 {strides = array<i32>} : memref<8x1xf32, #tpu.memory_space<vmem>>, vector<8x1xf32>,
    } else {
    }
    %c0 = arith.constant 0 : index
    %c0_1 = arith.constant 0 : index
    %3 = vector.load %arg1[%c0, %c0_1] : memref<8x256xf32, #tpu.memory_space<vmem>>, vector<8x256xf32>
    %c0_2 = arith.constant 0 : index
    %c0_3 = arith.constant 0 : index
    %4 = vector.load %arg2[%c0_2, %c0_3] : memref<8x256xf32, #tpu.memory_space<vmem>>, vector<8x256xf32>
    %c0_4 = arith.constant 0 : index
    %c0_5 = arith.constant 0 : index
    %5 = vector.load %arg5[%c0_4, %c0_5] : memref<8x1xf32, #tpu.memory_space<vmem>>, vector<8x1xf32>
    %6 = arith.mulf %3, %4 : vector<8x256xf32>
    %cst = arith.constant dense<0.000000e+00> : vector<8xf32>
    %7 = vector.multi_reduction <add>, %6, %cst [1] : vector<8x256xf32> to vector<8xf32>
    %8 = vector.shape_cast %7 : vector<8xf32> to vector<8x1xf32>
    %9 = arith.addf %5, %8 : vector<8x1xf32>
    %c0_6 = arith.constant 0 : index
    %c0_7 = arith.constant 0 : index
    %10 = vector.load %arg5[%c0_6, %c0_7] : memref<8x1xf32, #tpu.memory_space<vmem>>, vector<8x1xf32>
    tpu.vector_store %arg5[%c0_6, %c0_7], %9 {strides = array<i32>} : memref<8x1xf32, #tpu.memory_space<vmem>>, vector<8x1xf32>,
    %c0_8 = arith.constant 0 : index
    %c0_9 = arith.constant 0 : index
    %11 = vector.load %arg6[%c0_8, %c0_9] : memref<8x1xf32, #tpu.memory_space<vmem>>, vector<8x1xf32>
    %12 = arith.addf %3, %4 : vector<8x256xf32>
    %cst_10 = arith.constant dense<0.000000e+00> : vector<8xf32>
    %13 = vector.multi_reduction <add>, %12, %cst_10 [1] : vector<8x256xf32> to vector<8xf32>
    %14 = vector.shape_cast %13 : vector<8xf32> to vector<8x1xf32>
    %15 = arith.addf %11, %14 : vector<8x1xf32>
    %c0_11 = arith.constant 0 : index
    %c0_12 = arith.constant 0 : index
    %16 = vector.load %arg6[%c0_11, %c0_12] : memref<8x1xf32, #tpu.memory_space<vmem>>, vector<8x1xf32>
    tpu.vector_store %arg6[%c0_11, %c0_12], %15 {strides = array<i32>} : memref<8x1xf32, #tpu.memory_space<vmem>>, vector<8x1xf32>,
    %c0_i32_13 = arith.constant 0 : i32
    %17 = arith.cmpi eq, %arg0, %c0_i32_13 : i32
    %18 = arith.extui %17 : i1 to i32
    %c0_i32_14 = arith.constant 0 : i32
    %19 = arith.cmpi ne, %18, %c0_i32_14 : i32
    scf.if %19 {
      %c0_15 = arith.constant 0 : index
      %c0_16 = arith.constant 0 : index
      %20 = vector.load %arg5[%c0_15, %c0_16] : memref<8x1xf32, #tpu.memory_space<vmem>>, vector<8x1xf32>
      %c0_17 = arith.constant 0 : index
      %c0_18 = arith.constant 0 : index
      %21 = vector.load %arg3[%c0_17, %c0_18] : memref<8x1xf32, #tpu.memory_space<vmem>>, vector<8x1xf32>
      tpu.vector_store %arg3[%c0_17, %c0_18], %20 {strides = array<i32>} : memref<8x1xf32, #tpu.memory_space<vmem>>, vector<8x1xf32>,
      %c0_19 = arith.constant 0 : index
      %c0_20 = arith.constant 0 : index
      %22 = vector.load %arg6[%c0_19, %c0_20] : memref<8x1xf32, #tpu.memory_space<vmem>>, vector<8x1xf32>
      %c0_21 = arith.constant 0 : index
      %c0_22 = arith.constant 0 : index
      %23 = vector.load %arg4[%c0_21, %c0_22] : memref<8x1xf32, #tpu.memory_space<vmem>>, vector<8x1xf32>
      tpu.vector_store %arg4[%c0_21, %c0_22], %22 {strides = array<i32>} : memref<8x1xf32, #tpu.memory_space<vmem>>, vector<8x1xf32>,
    } else {
    }
    return
  }
  func.func @transform_0(%arg0: i32) -> (i32, i32) {
    %c0_i32 = arith.constant 0 : i32
    %c0_i32_0 = arith.constant 0 : i32
    return %c0_i32, %arg0 : i32, i32
  }
  func.func @transform_1(%arg0: i32) -> (i32, i32) {
    %c0_i32 = arith.constant 0 : i32
    %c0_i32_0 = arith.constant 0 : i32
    return %c0_i32, %arg0 : i32, i32
  }
  func.func @transform_2(%arg0: i32) -> (i32, i32) {
    %c0_i32 = arith.constant 0 : i32
    %c0_i32_0 = arith.constant 0 : i32
    %c0_i32_1 = arith.constant 0 : i32
    return %c0_i32, %c0_i32_0 : i32, i32
  }
  func.func @transform_3(%arg0: i32) -> (i32, i32) {
    %c0_i32 = arith.constant 0 : i32
    %c0_i32_0 = arith.constant 0 : i32
    %c0_i32_1 = arith.constant 0 : i32
    return %c0_i32, %c0_i32_0 : i32, i32
  }
}

</mosaic_0001>

<bundles_post_ra>
// kernel: tpu_custom_call.1
= control target key start
LH: loop header
LB: loop body
LE: loop exit
PB: predicated region body
PF: predicated region fallthrough
CT: control target
= control target key end

     0   :  { %9 = vsyncpa [#allocation5], 0  ;;  %s192_s0 = inlined_call_operand.hbm [shape: f32[8,256], index: 0, kind: input, shape index: {}]   ;;  %s193_s1 = inlined_call_operand.hbm [shape: f32[8,256], index: 1, kind: input, shape index: {}]   ;;  %s194_s2 = inlined_call_operand.vmem [shape: f32[8,1], index: 2, kind: output, shape index: {0}]   ;;  %s195_s3 = inlined_call_operand.vmem [shape: f32[8,1], index: 3, kind: output, shape index: {1}]  }
   0x1   :  { %10 = vsyncpa [#allocation7], 0  ;;  %s133_s12 = smov [#allocation4]   ;;  %s134_s14 = smov [#allocation6]  }
   0x2   :  { %s17_s13 = sshll.u32 %s133_s12, 4  ;;  %s27_s15 = sshll.u32 %s134_s14, 4  ;;  %s18_s13 = int_to_ptr.vmem [resolvable:$true] %s17_s13  ;;  %s28_s15 = int_to_ptr.vmem [resolvable:$true] %s27_s15 }
   0x3   :  { %s85_s18 = scalar_lea.hbm %s192_s0, 256 }
   0x4   :  { %p86_p0 = scmp.ne.s32.totalorder %s192_s0, %s85_s18  ;;  %p89_p1 = scmp.lt.u32.totalorder %s85_s18, %s192_s0 }
   0x6   :  { %p91_p2 = pnand %p89_p1, %p86_p0 }
   0x8   :  { %94 = shalt.err (!%p91_p2)
}
   0x9   :  { %s95_s23 = scalar_lea.vmem %s18_s13, 256  ;;  %p100_p4 = scmp.lt.s32.totalorder %s18_s13, %s18_s13 }
   0xa   :  { %p96_p3 = scmp.ne.s32.totalorder %s18_s13, %s95_s23  ;;  %p101_p5 = scmp.lt.s32.totalorder %s95_s23, %s95_s23 }
   0xc   :  { %p102_p6 = por %p101_p5, %p100_p4 }
   0xe   :  { %p103_p7 = pnand %p102_p6, %p96_p3 }
  0x10   :  { %106 = shalt.err (!%p103_p7)
}
  0x11   :  { %20 = dma.hbm_to_vmem [thread:$0]  %s192_s0, 256, %s18_s13, [#allocation5]  }
  0x12   :  { %s107_s28 = scalar_lea.hbm %s193_s1, 256 }
  0x13   :  { %p108_p8 = scmp.ne.s32.totalorder %s193_s1, %s107_s28  ;;  %p111_p9 = scmp.lt.u32.totalorder %s107_s28, %s193_s1 }
  0x15   :  { %p113_p10 = pnand %p111_p9, %p108_p8 }
  0x17   :  { %116 = shalt.err (!%p113_p10)
}
  0x18   :  { %s117_s6 = scalar_lea.vmem %s28_s15, 256  ;;  %p122_p12 = scmp.lt.s32.totalorder %s28_s15, %s28_s15 }
  0x19   :  { %p118_p11 = scmp.ne.s32.totalorder %s28_s15, %s117_s6  ;;  %p123_p13 = scmp.lt.s32.totalorder %s117_s6, %s117_s6 }
  0x1b   :  { %p124_p0 = por %p123_p13, %p122_p12 }
  0x1d   :  { %p125_p1 = pnand %p124_p0, %p118_p11 }
  0x1f   :  { %128 = shalt.err (!%p125_p1)
}
  0x20   :  { %30 = dma.hbm_to_vmem [thread:$0]  %s193_s1, 256, %s28_s15, [#allocation7]  }
  0x21   :  { %129 = dma.done.wait [#allocation5], 256  }
  0x22   :  { %130 = vsyncadd [#allocation5], 4294967040 }
  0x23   :  { %131 = dma.done.wait [#allocation7], 256  }
  0x24   :  { %132 = vsyncadd [#allocation7], 4294967040  ;;  %vm41_vm0 = vcmask 7168   ;;  %v135_v0 = vmov 0.0   ;;  %v44_v1 = vld [vmem:[#allocation4] sm:$0xff]  ;;  %v45_v2 = vld [vmem:[#allocation4 + $0x8] sm:$0xff] }
  0x25   :  { %42 = vst.msk [vmem:[#allocation2] sm:$0xff] %vm41_vm0, %v135_v0  ;;  %43 = vst.msk [vmem:[#allocation3] sm:$0xff] %vm41_vm0, %v135_v0  ;;  %v46_v3 = vld [vmem:[#allocation6] sm:$0xff]  ;;  %v47_v4 = vld [vmem:[#allocation6 + $0x8] sm:$0xff] }
  0x26   :  { %v49_v5 = vmul.f32 %v46_v3, %v44_v1  ;;  %v50_v6 = vmul.f32 %v47_v4, %v45_v2  ;;  %v58_v7 = vadd.f32 %v46_v3, %v44_v1  ;;  %v59_v8 = vadd.f32 %v47_v4, %v45_v2 }
  0x28   :  { %v51_v9 = vadd.f32 %v50_v6, %v49_v5  ;;  %v60_v10 = vadd.f32 %v59_v8, %v58_v7 }
  0x2a   :  { %52 = vadd.xlane.f32.xlu0 %v51_v9 }
  0x2c   :  { %v48_v11 = vld [vmem:[#allocation2] sm:$0xff]  ;;  %v57_v14 = vld [vmem:[#allocation3] sm:$0xff] }
  0x2e   :  { %61 = vadd.xlane.f32.xlu0 %v60_v10 }
  0xb7   :  { %v53_v12 = vpop.xlane.xlu0 %52 }
  0xb8   :  { %v54_v13 = vadd.f32 %v53_v12, %v48_v11 }
  0xba   :  { %56 = vst.msk [vmem:[#allocation2] sm:$0xff] %vm41_vm0, %v54_v13 }
  0xbb   :  { %v62_v15 = vpop.xlane.xlu0 %61 }
  0xbc   :  { %v63_v16 = vadd.f32 %v62_v15, %v57_v14 }
  0xbe   :  { %64 = vst.msk [vmem:[#allocation3] sm:$0xff] %vm41_vm0, %v63_v16 }
  0xc1   :  { %v68_v17 = vld [vmem:[#allocation2] sm:$0xff] }
  0xc2   :  { %69 = vst.msk [vmem:[%s194_s2] sm:$0xff] %vm41_vm0, %v68_v17 }
  0xc5   :  { %v70_v18 = vld [vmem:[#allocation3] sm:$0xff] }
  0xc6   :  { %71 = vst.msk [vmem:[%s195_s3] sm:$0xff] %vm41_vm0, %v70_v18 }
  0xc7   :  { %80 = vsyncpa [#allocation5], 1 }
  0xc8   :  { %81 = vsyncpa [#allocation7], 1 }

</bundles_post_ra>
